<compile_context>
chip_gen: v7x
topology: tpu7x:2x2x1
jax: 0.10.0
libtpu: 0.0.40
codegen_flags: <defaults>
</compile_context>

<pallas_src>
import functools

import jax
import jax.numpy as jnp
from jax.experimental import pallas as pl
from jax.experimental.pallas import tpu as pltpu

_BIG = 1.0e12          # same masking constant as the PyTorch module
_ROW_TILE_MAX = 256    # rows per block (sublane-multiple)
_COL_TILE_MAX = 2048   # lanes per block (128-multiple)


def _round_up(x: int, m: int) -> int:
    return (x + m - 1) // m * m


def _cdiv(a: int, b: int) -> int:
    return (a + b - 1) // b


def _gp_loss_kernel(pred_ref, true_ref, out_ref,
                    m_neg, l_neg, m_pos, l_pos,
                    *, n_cols, col_tile, mask_cols):
    j = pl.program_id(1)

    @pl.when(j == 0)
    def _init():
        # m=0 / l=1 bakes in the implicit appended 0 of logsumexp([x..., 0])
        # exactly once per row, and guarantees masked (-_BIG) entries
        # contribute exp(-_BIG - m) == 0.
        m_neg[...] = jnp.zeros_like(m_neg)
        m_pos[...] = jnp.zeros_like(m_pos)
        l_neg[...] = jnp.ones_like(l_neg)
        l_pos[...] = jnp.ones_like(l_pos)

    p = pred_ref[...].astype(jnp.float32)        # (TR, TC)
    msk = true_ref[...] != 0                     # (TR, TC) bool, y_true == 1

    # (1 - 2*y_true) * y_pred, for 0/1 labels.
    sp = jnp.where(msk, -p, p)

    neg_c = jnp.where(msk, -_BIG, sp)            # neg-branch candidates
    pos_c = jnp.where(msk, sp, -_BIG)            # pos-branch candidates

    if mask_cols:   # trace-time flag: only emitted when the shape is ragged
        col = j * col_tile + jax.lax.broadcasted_iota(jnp.int32, p.shape, 1)
        col_ok = col < n_cols
        neg_c = jnp.where(col_ok, neg_c, -_BIG)
        pos_c = jnp.where(col_ok, pos_c, -_BIG)

    m_neg_old = m_neg[...]
    m_pos_old = m_pos[...]
    m_neg_new = jnp.maximum(m_neg_old, jnp.max(neg_c, axis=-1, keepdims=True))
    m_pos_new = jnp.maximum(m_pos_old, jnp.max(pos_c, axis=-1, keepdims=True))

    # Single exp per element: each element feeds exactly one of the two
    # logsumexps; the other branch would be exp(-1e12 - m) == 0 anyway.
    e = jnp.exp(sp - jnp.where(msk, m_pos_new, m_neg_new))
    if mask_cols:
        e = jnp.where(col_ok, e, 0.0)
    e_pos = jnp.where(msk, e, 0.0)
    e_neg = e - e_pos

    l_neg[...] = (l_neg[...] * jnp.exp(m_neg_old - m_neg_new)
                  + jnp.sum(e_neg, axis=-1, keepdims=True))
    l_pos[...] = (l_pos[...] * jnp.exp(m_pos_old - m_pos_new)
                  + jnp.sum(e_pos, axis=-1, keepdims=True))
    m_neg[...] = m_neg_new
    m_pos[...] = m_pos_new

    @pl.when(j == pl.num_programs(1) - 1)
    def _fin():
        out_ref[...] = (m_neg[...] + jnp.log(l_neg[...])
                        + m_pos[...] + jnp.log(l_pos[...]))


@jax.jit
def global_pointer_loss(y_pred: jax.Array, y_true: jax.Array) -> jax.Array:
    """y_pred, y_true: [B, H, L, L] (y_true holds 0/1 labels).
    Returns the scalar mean loss (f32)."""
    b, h, l = y_pred.shape[:3]
    n_rows = b * h
    n_cols = l * l

    pred2d = y_pred.reshape(n_rows, n_cols)   # native dtype (f32 or bf16)
    true2d = y_true.reshape(n_rows, n_cols)   # native dtype, no cast pass

    # Minimal physical pad only when the whole array is smaller than one
    # (8, 128) vreg tile; all other ragged shapes are handled in-kernel
    # (partial boundary blocks + iota column mask), so no extra HBM pad pass.
    rows_phys = max(n_rows, 8)
    cols_phys = max(n_cols, 128)
    if (rows_phys, cols_phys) != (n_rows, n_cols):
        pred2d = jnp.pad(pred2d, ((0, rows_phys - n_rows),
                                  (0, cols_phys - n_cols)))
        true2d = jnp.pad(true2d, ((0, rows_phys - n_rows),
                                  (0, cols_phys - n_cols)))

    # Row tile: aim for >= 2 steps on the "parallel" row axis whenever
    # possible (so v7x's two TensorCores both get work) with small padding
    # waste; always a multiple of 8.
    target_row_tiles = max(2, _cdiv(rows_phys, _ROW_TILE_MAX))
    row_tile = min(_ROW_TILE_MAX,
                   _round_up(_cdiv(rows_phys, target_row_tiles), 8))

    # Column tile: large (amortizes ~0.35us/step overhead), 128-multiple,
    # never larger than the physical column count.
    col_tile = min(_COL_TILE_MAX, (cols_phys // 128) * 128)

    grid = (_cdiv(rows_phys, row_tile), _cdiv(cols_phys, col_tile))
    mask_cols = (grid[1] * col_tile != n_cols)   # block coverage overshoots

    pred_bytes = pred2d.dtype.itemsize
    true_bytes = true2d.dtype.itemsize
    cost = pl.CostEstimate(
        flops=13 * rows_phys * cols_phys,
        transcendentals=rows_phys * cols_phys,          # 1 exp / element
        bytes_accessed=rows_phys * cols_phys * (pred_bytes + true_bytes)
                       + 4 * rows_phys,
    )

    kernel = functools.partial(_gp_loss_kernel, n_cols=n_cols,
                               col_tile=col_tile, mask_cols=mask_cols)

    per_row = pl.pallas_call(
        kernel,
        out_shape=jax.ShapeDtypeStruct((rows_phys, 1), jnp.float32),
        grid_spec=pltpu.PrefetchScalarGridSpec(
            num_scalar_prefetch=0,
            grid=grid,
            in_specs=[
                pl.BlockSpec((row_tile, col_tile), lambda i, j: (i, j)),
                pl.BlockSpec((row_tile, col_tile), lambda i, j: (i, j)),
            ],
            out_specs=pl.BlockSpec((row_tile, 1), lambda i, j: (i, 0)),
            scratch_shapes=[pltpu.VMEM((row_tile, 1), jnp.float32)] * 4,
        ),
        compiler_params=pltpu.CompilerParams(
            dimension_semantics=("parallel", "arbitrary"),
            vmem_limit_bytes=32 * 1024 * 1024,
        ),
        cost_estimate=cost,
    )(pred2d, true2d)

    # Tiny final reduction in plain JAX (keeps the row axis core-parallel and
    # avoids a long single-scalar accumulation chain inside the kernel).
    return jnp.sum(per_row[:n_rows, 0]) / jnp.float32(n_rows)


def _reference_loss(y_pred, y_true):
    """Pure-JAX reference mirroring the PyTorch forward exactly."""
    b, h, l = y_pred.shape[:3]
    yp = y_pred.reshape(b * h, l * l).astype(jnp.float32)
    yt = y_true.reshape(b * h, l * l).astype(jnp.float32)
    yp = (1.0 - 2.0 * yt) * yp
    yp_neg = yp - yt * _BIG
    yp_pos = yp - (1.0 - yt) * _BIG
    zero = jnp.zeros((b * h, 1), jnp.float32)
    yp_neg = jnp.concatenate([yp_neg, zero], axis=-1)
    yp_pos = jnp.concatenate([yp_pos, zero], axis=-1)
    neg = jax.scipy.special.logsumexp(yp_neg, axis=-1)
    pos = jax.scipy.special.logsumexp(yp_pos, axis=-1)
    return jnp.mean(neg + pos)


if __name__ == "__main__":
    # Small shapes consistent with the module: batch=2, heads=4, seq=8
    B, H, L = 2, 4, 8
    key = jax.random.PRNGKey(0)
    k_pred, k_true = jax.random.split(key)

    y_pred = jax.random.normal(k_pred, (B, H, L, L), dtype=jnp.float32) * 3.0
    y_true = jax.random.bernoulli(k_true, p=0.15, shape=(B, H, L, L)).astype(
        jnp.float32
    )

    loss = jax.block_until_ready(global_pointer_loss(y_pred, y_true))
    ref = jax.block_until_ready(_reference_loss(y_pred, y_true))
    assert jnp.allclose(loss, ref, rtol=1e-4, atol=1e-4), (loss, ref)

    print("KERNEL_OK")
</pallas_src>

<mosaic_0001>
module attributes {stable_mosaic.version = 11 : i64} {
  func.func @_gp_loss_kernel(%arg0: i32, %arg1: i32, %arg2: memref<8x128xf32, #tpu.memory_space<vmem>>, %arg3: memref<8x128xf32, #tpu.memory_space<vmem>>, %arg4: memref<8x1xf32, #tpu.memory_space<vmem>>, %arg5: memref<8x1xf32, #tpu.memory_space<vmem>>, %arg6: memref<8x1xf32, #tpu.memory_space<vmem>>, %arg7: memref<8x1xf32, #tpu.memory_space<vmem>>, %arg8: memref<8x1xf32, #tpu.memory_space<vmem>>) attributes {dimension_semantics = [#tpu.dimension_semantics<parallel>, #tpu.dimension_semantics<arbitrary>], iteration_bounds = array<i64: 1, 1>, scalar_prefetch = 0 : i64, scratch_operands = 4 : i64, tpu.core_type = #tpu.core_type<tc>, window_params = [{transform_indices = @transform_0, window_bounds = array<i64: 8, 128>}, {transform_indices = @transform_1, window_bounds = array<i64: 8, 128>}, {transform_indices = @transform_2, window_bounds = array<i64: 8, 1>}]} {
    %c0_i32 = arith.constant 0 : i32
    %0 = arith.cmpi eq, %arg1, %c0_i32 : i32
    %1 = arith.extui %0 : i1 to i32
    %c0_i32_0 = arith.constant 0 : i32
    %2 = arith.cmpi ne, %1, %c0_i32_0 : i32
    scf.if %2 {
      %cst_33 = arith.constant 0.000000e+00 : f32
      %65 = vector.broadcast %cst_33 : f32 to vector<8x1xf32>
      %c0_34 = arith.constant 0 : index
      %c0_35 = arith.constant 0 : index
      %66 = vector.load %arg5[%c0_34, %c0_35] : memref<8x1xf32, #tpu.memory_space<vmem>>, vector<8x1xf32>
      tpu.vector_store %arg5[%c0_34, %c0_35], %65 {strides = array<i32>} : memref<8x1xf32, #tpu.memory_space<vmem>>, vector<8x1xf32>,
      %cst_36 = arith.constant 0.000000e+00 : f32
      %67 = vector.broadcast %cst_36 : f32 to vector<8x1xf32>
      %c0_37 = arith.constant 0 : index
      %c0_38 = arith.constant 0 : index
      %68 = vector.load %arg7[%c0_37, %c0_38] : memref<8x1xf32, #tpu.memory_space<vmem>>, vector<8x1xf32>
      tpu.vector_store %arg7[%c0_37, %c0_38], %67 {strides = array<i32>} : memref<8x1xf32, #tpu.memory_space<vmem>>, vector<8x1xf32>,
      %cst_39 = arith.constant 1.000000e+00 : f32
      %69 = vector.broadcast %cst_39 : f32 to vector<8x1xf32>
      %c0_40 = arith.constant 0 : index
      %c0_41 = arith.constant 0 : index
      %70 = vector.load %arg6[%c0_40, %c0_41] : memref<8x1xf32, #tpu.memory_space<vmem>>, vector<8x1xf32>
      tpu.vector_store %arg6[%c0_40, %c0_41], %69 {strides = array<i32>} : memref<8x1xf32, #tpu.memory_space<vmem>>, vector<8x1xf32>,
      %cst_42 = arith.constant 1.000000e+00 : f32
      %71 = vector.broadcast %cst_42 : f32 to vector<8x1xf32>
      %c0_43 = arith.constant 0 : index
      %c0_44 = arith.constant 0 : index
      %72 = vector.load %arg8[%c0_43, %c0_44] : memref<8x1xf32, #tpu.memory_space<vmem>>, vector<8x1xf32>
      tpu.vector_store %arg8[%c0_43, %c0_44], %71 {strides = array<i32>} : memref<8x1xf32, #tpu.memory_space<vmem>>, vector<8x1xf32>,
    } else {
    }
    %c0 = arith.constant 0 : index
    %c0_1 = arith.constant 0 : index
    %3 = vector.load %arg2[%c0, %c0_1] : memref<8x128xf32, #tpu.memory_space<vmem>>, vector<8x128xf32>
    %c0_2 = arith.constant 0 : index
    %c0_3 = arith.constant 0 : index
    %4 = vector.load %arg3[%c0_2, %c0_3] : memref<8x128xf32, #tpu.memory_space<vmem>>, vector<8x128xf32>
    %cst = arith.constant 0.000000e+00 : f32
    %5 = vector.broadcast %cst : f32 to vector<8x128xf32>
    %6 = arith.cmpf one, %4, %5 : vector<8x128xf32>
    %cst_4 = arith.constant 0.000000e+00 : f32
    %7 = vector.broadcast %cst_4 : f32 to vector<8x128xf32>
    %8 = arith.subf %7, %3 : vector<8x128xf32>
    %9 = arith.select %6, %8, %3 : vector<8x128xi1>, vector<8x128xf32>
    %cst_5 = arith.constant -9.99999995E+11 : f32
    %10 = vector.broadcast %cst_5 : f32 to vector<8x128xf32>
    %11 = arith.select %6, %10, %9 : vector<8x128xi1>, vector<8x128xf32>
    %cst_6 = arith.constant -9.99999995E+11 : f32
    %12 = vector.broadcast %cst_6 : f32 to vector<8x128xf32>
    %13 = arith.select %6, %9, %12 : vector<8x128xi1>, vector<8x128xf32>
    %c128_i32 = arith.constant 128 : i32
    %14 = arith.muli %arg1, %c128_i32 : i32
    %15 = tpu.iota {dimensions = array<i32: 1>} : vector<8x128xi32>
    %16 = vector.broadcast %14 : i32 to vector<8x128xi32>
    %17 = arith.addi %16, %15 : vector<8x128xi32>
    %c64_i32 = arith.constant 64 : i32
    %18 = vector.broadcast %c64_i32 : i32 to vector<8x128xi32>
    %19 = arith.cmpi slt, %17, %18 : vector<8x128xi32>
    %cst_7 = arith.constant -9.99999995E+11 : f32
    %20 = vector.broadcast %cst_7 : f32 to vector<8x128xf32>
    %21 = arith.select %19, %11, %20 : vector<8x128xi1>, vector<8x128xf32>
    %cst_8 = arith.constant -9.99999995E+11 : f32
    %22 = vector.broadcast %cst_8 : f32 to vector<8x128xf32>
    %23 = arith.select %19, %13, %22 : vector<8x128xi1>, vector<8x128xf32>
    %c0_9 = arith.constant 0 : index
    %c0_10 = arith.constant 0 : index
    %24 = vector.load %arg5[%c0_9, %c0_10] : memref<8x1xf32, #tpu.memory_space<vmem>>, vector<8x1xf32>
    %c0_11 = arith.constant 0 : index
    %c0_12 = arith.constant 0 : index
    %25 = vector.load %arg7[%c0_11, %c0_12] : memref<8x1xf32, #tpu.memory_space<vmem>>, vector<8x1xf32>
    %cst_13 = arith.constant dense<0xFF800000> : vector<8xf32>
    %26 = vector.multi_reduction <maximumf>, %21, %cst_13 [1] : vector<8x128xf32> to vector<8xf32>
    %27 = vector.shape_cast %26 : vector<8xf32> to vector<8x1xf32>
    %28 = arith.maximumf %24, %27 : vector<8x1xf32>
    %cst_14 = arith.constant dense<0xFF800000> : vector<8xf32>
    %29 = vector.multi_reduction <maximumf>, %23, %cst_14 [1] : vector<8x128xf32> to vector<8xf32>
    %30 = vector.shape_cast %29 : vector<8xf32> to vector<8x1xf32>
    %31 = arith.maximumf %25, %30 : vector<8x1xf32>
    %32 = vector.shape_cast %31 : vector<8x1xf32> to vector<8x1xf32>
    %33 = vector.broadcast %32 : vector<8x1xf32> to vector<8x128xf32>
    %34 = vector.shape_cast %28 : vector<8x1xf32> to vector<8x1xf32>
    %35 = vector.broadcast %34 : vector<8x1xf32> to vector<8x128xf32>
    %36 = arith.select %6, %33, %35 : vector<8x128xi1>, vector<8x128xf32>
    %37 = arith.subf %9, %36 : vector<8x128xf32>
    %38 = math.exp %37 : vector<8x128xf32>
    %cst_15 = arith.constant 0.000000e+00 : f32
    %39 = vector.broadcast %cst_15 : f32 to vector<8x128xf32>
    %40 = arith.select %19, %38, %39 : vector<8x128xi1>, vector<8x128xf32>
    %cst_16 = arith.constant 0.000000e+00 : f32
    %41 = vector.broadcast %cst_16 : f32 to vector<8x128xf32>
    %42 = arith.select %6, %40, %41 : vector<8x128xi1>, vector<8x128xf32>
    %43 = arith.subf %40, %42 : vector<8x128xf32>
    %c0_17 = arith.constant 0 : index
    %c0_18 = arith.constant 0 : index
    %44 = vector.load %arg6[%c0_17, %c0_18] : memref<8x1xf32, #tpu.memory_space<vmem>>, vector<8x1xf32>
    %45 = arith.subf %24, %28 : vector<8x1xf32>
    %46 = math.exp %45 : vector<8x1xf32>
    %47 = arith.mulf %44, %46 : vector<8x1xf32>
    %cst_19 = arith.constant dense<0.000000e+00> : vector<8xf32>
    %48 = vector.multi_reduction <add>, %43, %cst_19 [1] : vector<8x128xf32> to vector<8xf32>
    %49 = vector.shape_cast %48 : vector<8xf32> to vector<8x1xf32>
    %50 = arith.addf %47, %49 : vector<8x1xf32>
    %c0_20 = arith.constant 0 : index
    %c0_21 = arith.constant 0 : index
    %51 = vector.load %arg6[%c0_20, %c0_21] : memref<8x1xf32, #tpu.memory_space<vmem>>, vector<8x1xf32>
    tpu.vector_store %arg6[%c0_20, %c0_21], %50 {strides = array<i32>} : memref<8x1xf32, #tpu.memory_space<vmem>>, vector<8x1xf32>,
    %c0_22 = arith.constant 0 : index
    %c0_23 = arith.constant 0 : index
    %52 = vector.load %arg8[%c0_22, %c0_23] : memref<8x1xf32, #tpu.memory_space<vmem>>, vector<8x1xf32>
    %53 = arith.subf %25, %31 : vector<8x1xf32>
    %54 = math.exp %53 : vector<8x1xf32>
    %55 = arith.mulf %52, %54 : vector<8x1xf32>
    %cst_24 = arith.constant dense<0.000000e+00> : vector<8xf32>
    %56 = vector.multi_reduction <add>, %42, %cst_24 [1] : vector<8x128xf32> to vector<8xf32>
    %57 = vector.shape_cast %56 : vector<8xf32> to vector<8x1xf32>
    %58 = arith.addf %55, %57 : vector<8x1xf32>
    %c0_25 = arith.constant 0 : index
    %c0_26 = arith.constant 0 : index
    %59 = vector.load %arg8[%c0_25, %c0_26] : memref<8x1xf32, #tpu.memory_space<vmem>>, vector<8x1xf32>
    tpu.vector_store %arg8[%c0_25, %c0_26], %58 {strides = array<i32>} : memref<8x1xf32, #tpu.memory_space<vmem>>, vector<8x1xf32>,
    %c0_27 = arith.constant 0 : index
    %c0_28 = arith.constant 0 : index
    %60 = vector.load %arg5[%c0_27, %c0_28] : memref<8x1xf32, #tpu.memory_space<vmem>>, vector<8x1xf32>
    tpu.vector_store %arg5[%c0_27, %c0_28], %28 {strides = array<i32>} : memref<8x1xf32, #tpu.memory_space<vmem>>, vector<8x1xf32>,
    %c0_29 = arith.constant 0 : index
    %c0_30 = arith.constant 0 : index
    %61 = vector.load %arg7[%c0_29, %c0_30] : memref<8x1xf32, #tpu.memory_space<vmem>>, vector<8x1xf32>
    tpu.vector_store %arg7[%c0_29, %c0_30], %31 {strides = array<i32>} : memref<8x1xf32, #tpu.memory_space<vmem>>, vector<8x1xf32>,
    %c0_i32_31 = arith.constant 0 : i32
    %62 = arith.cmpi eq, %arg1, %c0_i32_31 : i32
    %63 = arith.extui %62 : i1 to i32
    %c0_i32_32 = arith.constant 0 : i32
    %64 = arith.cmpi ne, %63, %c0_i32_32 : i32
    scf.if %64 {
      %c0_33 = arith.constant 0 : index
      %c0_34 = arith.constant 0 : index
      %65 = vector.load %arg5[%c0_33, %c0_34] : memref<8x1xf32, #tpu.memory_space<vmem>>, vector<8x1xf32>
      %c0_35 = arith.constant 0 : index
      %c0_36 = arith.constant 0 : index
      %66 = vector.load %arg6[%c0_35, %c0_36] : memref<8x1xf32, #tpu.memory_space<vmem>>, vector<8x1xf32>
      %67 = math.log %66 : vector<8x1xf32>
      %68 = arith.addf %65, %67 : vector<8x1xf32>
      %c0_37 = arith.constant 0 : index
      %c0_38 = arith.constant 0 : index
      %69 = vector.load %arg7[%c0_37, %c0_38] : memref<8x1xf32, #tpu.memory_space<vmem>>, vector<8x1xf32>
      %70 = arith.addf %68, %69 : vector<8x1xf32>
      %c0_39 = arith.constant 0 : index
      %c0_40 = arith.constant 0 : index
      %71 = vector.load %arg8[%c0_39, %c0_40] : memref<8x1xf32, #tpu.memory_space<vmem>>, vector<8x1xf32>
      %72 = math.log %71 : vector<8x1xf32>
      %73 = arith.addf %70, %72 : vector<8x1xf32>
      %c0_41 = arith.constant 0 : index
      %c0_42 = arith.constant 0 : index
      %74 = vector.load %arg4[%c0_41, %c0_42] : memref<8x1xf32, #tpu.memory_space<vmem>>, vector<8x1xf32>
      tpu.vector_store %arg4[%c0_41, %c0_42], %73 {strides = array<i32>} : memref<8x1xf32, #tpu.memory_space<vmem>>, vector<8x1xf32>,
    } else {
    }
    return
  }
  func.func @transform_0(%arg0: i32, %arg1: i32) -> (i32, i32) {
    %c0_i32 = arith.constant 0 : i32
    return %arg0, %arg1 : i32, i32
  }
  func.func @transform_1(%arg0: i32, %arg1: i32) -> (i32, i32) {
    %c0_i32 = arith.constant 0 : i32
    return %arg0, %arg1 : i32, i32
  }
  func.func @transform_2(%arg0: i32, %arg1: i32) -> (i32, i32) {
    %c0_i32 = arith.constant 0 : i32
    %c0_i32_0 = arith.constant 0 : i32
    return %arg0, %c0_i32 : i32, i32
  }
}

</mosaic_0001>

<bundles_post_ra>
// kernel: global_pointer_loss.1
= control target key start
LH: loop header
LB: loop body
LE: loop exit
PB: predicated region body
PF: predicated region fallthrough
CT: control target
= control target key end

     0   :  { %v28_v0 = vlaneseq  ;;  %vm15_vm0 = vcmask 7168   ;;  %v115_v3 = vmov 0.0   ;;  %v116_v10 = vmov 0   ;;  %s159_s0 = inlined_call_operand.vmem [shape: f32[8,128], index: 0, kind: input, shape index: {}]   ;;  %s160_s1 = inlined_call_operand.vmem [shape: f32[8,128], index: 1, kind: input, shape index: {}]   ;;  %s161_s2 = inlined_call_operand.vmem [shape: f32[8,1], index: 2, kind: output, shape index: {}]  }
   0x1   :  { %v20_v1 = vld [vmem:[%s159_s0] sm:$0xff]  ;;  %16 = vst.msk [vmem:[#allocation2] sm:$0xff] %vm15_vm0, %v115_v3  ;;  %17 = vst.msk [vmem:[#allocation4] sm:$0xff] %vm15_vm0, %v115_v3  ;;  %103 = vset.pattern.permute.xlu1 %v116_v10  ;;  %104 = vset.pattern.permute.xlu0 %v116_v10  ;;  %v117_v11 = vmov 1.0  }
   0x2   :  { %v21_v2 = vld [vmem:[%s160_s1] sm:$0xff]  ;;  %v29_v4 = vand.u32 127, %v28_v0  ;;  %v23_v5 = vsub.f32 0.0, %v20_v1  ;;  %19 = vst.msk [vmem:[#allocation5] sm:$0xff] %vm15_vm0, %v117_v11  ;;  %18 = vst.msk [vmem:[#allocation3] sm:$0xff] %vm15_vm0, %v117_v11 }
   0x3   :  { %vm22_vm1 = vcmp.ne.f32.partialorder %v21_v2, 0.0 }
   0x4   :  { %v25_v6 = vsel %vm22_vm1, -1e+12, %v20_v1  ;;  %vm32_vm2 = vcmp.lt.s32.totalorder %v29_v4, 64  ;;  %v26_v7 = vsel %vm22_vm1, %v23_v5, -1e+12  ;;  %v24_v21 = vsel %vm22_vm1, %v23_v5, %v20_v1 }
   0x5   :  { %v33_v8 = vsel %vm32_vm2, %v25_v6, -1e+12  ;;  %v34_v9 = vsel %vm32_vm2, %v26_v7, -1e+12 }
   0x6   :  { %37 = vmax.xlane.f32.xlu0 %v33_v8 }
   0x8   :  { %v35_v12 = vld [vmem:[#allocation2] sm:$0xff]  ;;  %v36_v15 = vld [vmem:[#allocation4] sm:$0xff] }
   0x9   :  { %v70_v33 = vld [vmem:[#allocation5] sm:$0xff]  ;;  %v60_v35 = vld [vmem:[#allocation3] sm:$0xff] }
   0xa   :  { %40 = vmax.xlane.f32.xlu0 %v34_v9 }
  0x93   :  { %v38_v13 = vpop.xlane.xlu0 %37 }
  0x94   :  { %v39_v14 = vmax.f32 %v35_v12, %v38_v13 }
  0x96   :  { %v61_v16 = vsub.f32 %v35_v12, %v39_v14  ;;  %79 = vst.msk [vmem:[#allocation2] sm:$0xff] %vm15_vm0, %v39_v14 }
  0x97   :  { %v41_v17 = vpop.xlane.xlu0 %40 }
  0x98   :  { %v42_v18 = vmax.f32 %v36_v15, %v41_v17  ;;  %v62_v31 = vmul.f32 1.442695, %v61_v16 }
  0x9a   :  { %v71_v19 = vsub.f32 %v36_v15, %v42_v18  ;;  %80 = vst.msk [vmem:[#allocation4] sm:$0xff] %vm15_vm0, %v42_v18  ;;  %45 = vperm.xlu1 %103, %v42_v18  }
  0x9c   :  { %v72_v30 = vmul.f32 1.442695, %v71_v19 }
  0x9d   :  { %v84_v47 = vld [vmem:[#allocation2] sm:$0xff] }
  0x9e   :  { %50 = vperm.xlu1 %103, %v39_v14  }
  0xa1   :  { %v89_v49 = vld [vmem:[#allocation4] sm:$0xff] }
 0x119   :  { %v46_v20 = vpop.permute.xlu1 %45 }
 0x11d   :  { %v51_v22 = vpop.permute.xlu1 %50 }
 0x11e   :  { %v53_v23 = vsel %vm22_vm1, %v46_v20, %v51_v22 }
 0x11f   :  { %v54_v24 = vsub.f32 %v24_v21, %v53_v23 }
 0x121   :  { %v55_v25 = vmul.f32 1.442695, %v54_v24 }
 0x123   :  { %105 = vpow2.f32 %v55_v25 }
 0x124   :  { %107 = vpow2.f32 %v72_v30 }
 0x125   :  { %109 = vpow2.f32 %v62_v31 }
 0x12d   :  { %v106_v26 = vpop.eup %105 }
 0x12e   :  { %v57_v27 = vsel %vm32_vm2, %v106_v26, 0.0  ;;  %v108_v32 = vpop.eup %107 }
 0x12f   :  { %v58_v28 = vsel %vm22_vm1, %v57_v27, 0.0  ;;  %v110_v34 = vpop.eup %109  ;;  %v74_v36 = vmul.f32 %v108_v32, %v70_v33 }
 0x130   :  { %75 = vadd.xlane.f32.xlu1 %v58_v28  ;;  %v59_v29 = vsub.f32 %v57_v27, %v58_v28  ;;  %v64_v39 = vmul.f32 %v110_v34, %v60_v35 }
 0x132   :  { %65 = vadd.xlane.f32.xlu0 %v59_v29 }
 0x1bd   :  { %v76_v37 = vpop.xlane.xlu1 %75 }
 0x1be   :  { %v77_v38 = vadd.f32 %v76_v37, %v74_v36 }
 0x1bf   :  { %v66_v40 = vpop.xlane.xlu0 %65 }
 0x1c0   :  { %78 = vst.msk [vmem:[#allocation5] sm:$0xff] %vm15_vm0, %v77_v38  ;;  %v67_v41 = vadd.f32 %v66_v40, %v64_v39 }
 0x1c2   :  { %69 = vst.msk [vmem:[#allocation3] sm:$0xff] %vm15_vm0, %v67_v41 }
 0x1c7   :  { %v91_v42 = vld [vmem:[#allocation5] sm:$0xff] }
 0x1c9   :  { %v85_v43 = vld [vmem:[#allocation3] sm:$0xff] }
 0x1ca   :  { %111 = vlog2.f32 %v85_v43 }
 0x1cb   :  { %113 = vlog2.f32 %v91_v42 }
 0x1d4   :  { %v112_v44 = vpop.eup %111 }
 0x1d5   :  { %v87_v45 = vmul.f32 0.6931472, %v112_v44  ;;  %v114_v46 = vpop.eup %113 }
 0x1d6   :  { %v93_v50 = vmul.f32 0.6931472, %v114_v46 }
 0x1d7   :  { %v88_v48 = vadd.f32 %v87_v45, %v84_v47 }
 0x1d9   :  { %v90_v51 = vadd.f32 %v89_v49, %v88_v48 }
 0x1db   :  { %v94_v52 = vadd.f32 %v93_v50, %v90_v51 }
 0x1dd   :  { %95 = vst.msk [vmem:[%s161_s2] sm:$0xff] %vm15_vm0, %v94_v52 }

</bundles_post_ra>
